<compile_context>
chip_gen: v7x
topology: tpu7x:2x2x1
jax: 0.10.0
libtpu: 0.0.40
codegen_flags: <defaults>
</compile_context>

<pallas_src>
import functools
import math

import jax
import jax.numpy as jnp
from jax.experimental import pallas as pl
from jax.experimental.pallas import tpu as pltpu

LANE = 128      # lane width (last dim)
SUBLANE = 8     # sublane width (second-to-last dim)


def _round_up(n, m):
    return ((n + m - 1) // m) * m


def _pad_to(a, shape):
    pads = [(0, t - s) for s, t in zip(a.shape, shape)]
    return jnp.pad(a, pads)


def _full_spec(shape):
    # Whole-array block (no grid).
    return pl.BlockSpec(shape, lambda: (0,) * len(shape))


def _masked_log_softmax(y, valid_classes):
    """Max-stabilized log_softmax over axis=1 with padded columns masked to -inf.

    Safe as long as valid_classes >= 1 (at least one finite column per row).
    """
    col = jax.lax.broadcasted_iota(jnp.int32, y.shape, 1)
    y = jnp.where(col < valid_classes, y, -jnp.inf)
    m = jnp.max(y, axis=1, keepdims=True)
    s = y - m
    lse = jnp.log(jnp.sum(jnp.exp(s), axis=1, keepdims=True))
    return s - lse


# ---------------------------------------------------------------------------
# Kernels
# ---------------------------------------------------------------------------
def _build_small_kernel(num_layers, valid_classes):
    """Grid-less fused kernel. refs: x, w0, b0, ..., w_{L-1}, b_{L-1}, out."""

    def kernel(*refs):
        o_ref = refs[-1]
        h = refs[0][...]                                  # bf16 activations
        y = None
        for i in range(num_layers):
            if i > 0:
                h = jnp.maximum(y, 0.0).astype(jnp.bfloat16)   # ReLU, bf16 store
            w = refs[1 + 2 * i][...]                      # bf16 (in_p, out_p)
            b = refs[2 + 2 * i][...]                      # f32  (1, out_p)
            y = jnp.dot(h, w, preferred_element_type=jnp.float32) + b
        o_ref[...] = _masked_log_softmax(y, valid_classes)

    return kernel


def _build_ktiled_kernel(num_layers, valid_classes):
    """K-tiled layer-0 kernel.

    grid = (batch_blocks, k_steps); refs: x, w0, b0, ..., out, acc_scratch.
    Layer-0 partial products accumulate into f32 VMEM scratch; the finalize
    branch (last k step) adds the bias, runs the remaining (tiny) layers and
    the masked log_softmax, and writes the output block.
    """

    def kernel(*refs):
        o_ref = refs[-2]
        acc_ref = refs[-1]
        k = pl.program_id(1)

        @pl.when(k == 0)
        def _():
            acc_ref[...] = jnp.zeros_like(acc_ref)

        # Layer-0 partial matmul: (bm, tk) bf16 @ (tk, N0) bf16 -> f32.
        acc_ref[...] += jnp.dot(refs[0][...], refs[1][...],
                                preferred_element_type=jnp.float32)

        @pl.when(k == pl.num_programs(1) - 1)
        def _():
            h = acc_ref[...] + refs[2][...]               # layer-0 bias, f32
            for i in range(1, num_layers):
                h = jnp.maximum(h, 0.0).astype(jnp.bfloat16)
                w = refs[1 + 2 * i][...]
                b = refs[2 + 2 * i][...]
                h = jnp.dot(h, w, preferred_element_type=jnp.float32) + b
            o_ref[...] = _masked_log_softmax(h, valid_classes)

    return kernel


# ---------------------------------------------------------------------------
# Parameter preparation (hoisted: pad + bf16 cast happens ONCE, not per call)
# ---------------------------------------------------------------------------
def prepare_dnn_params(params, num_classes, *, k_tile_target=7680,
                       tiled_threshold_bytes=4 << 20):
    """params: list of (W (in, out) f32, b (1, out) f32); W transposed vs PyTorch."""
    dims = [params[0][0].shape[0]] + [w.shape[1] for (w, _) in params]
    dims_p = [_round_up(d, LANE) for d in dims]

    # Decide layer-0 K-tiling from the padded bf16 weight size.
    w0_bytes = dims_p[0] * dims_p[1] * 2
    use_tiled = w0_bytes > tiled_threshold_bytes
    if use_tiled:
        k_p = dims_p[0]
        k_steps = int(pl.cdiv(k_p, k_tile_target))
        tk = _round_up(int(pl.cdiv(k_p, k_steps)), LANE)
        dims_p[0] = tk * k_steps                 # pad K so the grid divides evenly
    else:
        tk = dims_p[0]
        k_steps = 1

    weights, biases = [], []
    for i, (w, b) in enumerate(params):
        wp = _pad_to(w.astype(jnp.float32),
                     (dims_p[i], dims_p[i + 1])).astype(jnp.bfloat16)
        bp = _pad_to(b.astype(jnp.float32), (1, dims_p[i + 1]))
        weights.append(wp)
        biases.append(bp)

    return dict(weights=weights, biases=biases, dims=dims, dims_p=dims_p,
                num_classes=num_classes, use_tiled=use_tiled, tk=tk,
                k_steps=k_steps)


# ---------------------------------------------------------------------------
# Forward pass
# ---------------------------------------------------------------------------
def _dnn_forward_impl(weights, biases, meta, x):
    num_classes = meta['num_classes']
    dims = meta['dims']
    dims_p = meta['dims_p']
    num_layers = len(weights)
    out_p = dims_p[-1]

    B = x.shape[0]
    Bp = _round_up(B, SUBLANE)
    if meta['use_tiled']:
        bm = min(256, Bp)                       # batch tile (parallel grid axis)
        Bp = _round_up(Bp, bm)
    else:
        bm = Bp

    # Only the activation is padded/cast per call; params were prepared once.
    xp = _pad_to(x.astype(jnp.bfloat16), (Bp, dims_p[0]))

    args = [xp]
    for w, b in zip(weights, biases):
        args += [w, b]

    flops = 2 * B * sum(dims[i] * dims[i + 1] for i in range(num_layers))
    bytes_accessed = (xp.size * 2
                      + sum(int(w.size) * 2 for w in weights)
                      + sum(int(b.size) * 4 for b in biases)
                      + Bp * out_p * 4)
    cost = pl.CostEstimate(flops=int(flops),
                           transcendentals=int(B * dims[-1]),
                           bytes_accessed=int(bytes_accessed))

    if not meta['use_tiled']:
        # Demo / small shapes: single grid-less launch, everything in VMEM.
        kernel = _build_small_kernel(num_layers, num_classes)
        vmem_est = bytes_accessed + Bp * out_p * 4
        out = pl.pallas_call(
            kernel,
            out_shape=jax.ShapeDtypeStruct((Bp, out_p), jnp.float32),
            in_specs=[_full_spec(a.shape) for a in args],
            out_specs=_full_spec((Bp, out_p)),
            cost_estimate=cost,
            compiler_params=pltpu.CompilerParams(
                vmem_limit_bytes=int(min(max(4 * vmem_est, 8 << 20), 48 << 20))),
        )(*args)
    else:
        tk = meta['tk']
        k_steps = meta['k_steps']
        n0_p = dims_p[1]
        kernel = _build_ktiled_kernel(num_layers, num_classes)

        in_specs = [pl.BlockSpec((bm, tk), lambda b, k: (b, k)),      # x tile
                    pl.BlockSpec((tk, n0_p), lambda b, k: (k, 0))]    # w0 tile
        for a in args[2:]:                                            # b0, w1, b1, ...
            in_specs.append(pl.BlockSpec(a.shape, lambda b, k: (0, 0)))
        out_spec = pl.BlockSpec((bm, out_p), lambda b, k: (b, 0))

        # Peak VMEM: double-buffered x/w0 tiles + f32 accumulator + tiny rest.
        vmem_est = (2 * (bm * tk + tk * n0_p) * 2
                    + bm * n0_p * 4
                    + 2 * sum(int(w.size) * 2 for w in weights[1:])
                    + 2 * sum(int(b.size) * 4 for b in biases)
                    + 2 * bm * out_p * 4)
        vmem_limit = int(min(max(2 * vmem_est, 16 << 20), 48 << 20))

        out = pl.pallas_call(
            kernel,
            out_shape=jax.ShapeDtypeStruct((Bp, out_p), jnp.float32),
            grid=(Bp // bm, k_steps),
            in_specs=in_specs,
            out_specs=out_spec,
            scratch_shapes=[pltpu.VMEM((bm, n0_p), jnp.float32)],
            cost_estimate=cost,
            compiler_params=pltpu.CompilerParams(
                dimension_semantics=("parallel", "arbitrary"),
                vmem_limit_bytes=vmem_limit),
        )(*args)

    # Strip batch / class padding (invariant: never return the raw padded out).
    return out[:B, :num_classes]


def make_dnn_forward(prepared):
    """Returns a jitted forward fn of x; padded params are baked as jit args."""
    meta = dict(prepared)
    weights = meta.pop('weights')
    biases = meta.pop('biases')
    impl = jax.jit(functools.partial(_dnn_forward_impl))
    fwd = jax.jit(lambda ws, bs, x: _dnn_forward_impl(ws, bs, meta, x))
    return lambda x: fwd(weights, biases, x)


# ---------------------------------------------------------------------------
# DNN parameter init (matches PyTorch _initialize_parameters:
# kaiming_normal_ weights (std = sqrt(2 / fan_in)), normal(std=0.01) bias).
# ---------------------------------------------------------------------------
def init_dnn_params(key, input_dim, hidden_layers, num_classes):
    dims = [input_dim] + list(hidden_layers) + [num_classes]
    params = []
    for i in range(len(dims) - 1):
        fan_in, fan_out = dims[i], dims[i + 1]
        key, kw, kb = jax.random.split(key, 3)
        std = math.sqrt(2.0 / fan_in)
        # PyTorch weight is (out, in); stored transposed as (in, out).
        w = jax.random.normal(kw, (fan_in, fan_out), jnp.float32) * std
        b = jax.random.normal(kb, (1, fan_out), jnp.float32) * 0.01
        params.append((w, b))
    return params


# ---------------------------------------------------------------------------
# Main
# ---------------------------------------------------------------------------
if __name__ == "__main__":

    def run_case(key, batch, input_dim, hidden_layers, num_classes,
                 k_tile_target, tiled_threshold_bytes):
        key, kx = jax.random.split(key)
        x = jax.random.normal(kx, (batch, input_dim), jnp.float32)
        params = init_dnn_params(key, input_dim, hidden_layers, num_classes)

        prepared = prepare_dnn_params(params, num_classes,
                                      k_tile_target=k_tile_target,
                                      tiled_threshold_bytes=tiled_threshold_bytes)
        fwd = make_dnn_forward(prepared)
        out = jax.block_until_ready(fwd(x))

        # Reference with matching numerics (bf16 matmul inputs, f32 accumulation).
        h = x.astype(jnp.bfloat16)
        for (w, b) in params[:-1]:
            y = jnp.dot(h, w.astype(jnp.bfloat16),
                        preferred_element_type=jnp.float32) + b
            h = jnp.maximum(y, 0.0).astype(jnp.bfloat16)
        w, b = params[-1]
        logits = jnp.dot(h, w.astype(jnp.bfloat16),
                         preferred_element_type=jnp.float32) + b
        ref = jax.nn.log_softmax(logits, axis=1)

        assert out.shape == (batch, num_classes)
        assert bool(jnp.all(jnp.isfinite(out)))
        assert jnp.allclose(out, ref, atol=1e-2, rtol=1e-2)
        # log_softmax rows must sum to 1 in probability space.
        assert jnp.allclose(jnp.sum(jnp.exp(out), axis=1), 1.0, atol=1e-3)
        return key

    key = jax.random.PRNGKey(0)

    # Case 1: demo shapes -> grid-less fused whole-array path.
    key = run_case(key, batch=4, input_dim=128, hidden_layers=[64, 32],
                   num_classes=10, k_tile_target=7680,
                   tiled_threshold_bytes=4 << 20)

    # Case 2: force the K-tiled (grid) path at small shapes to exercise the
    # code path used when in_dim is large (e.g. the original 52470).
    key = run_case(key, batch=4, input_dim=512, hidden_layers=[64],
                   num_classes=10, k_tile_target=256,
                   tiled_threshold_bytes=0)

    print("KERNEL_OK")
</pallas_src>

<mosaic_0001>
module attributes {stable_mosaic.version = 11 : i64} {
  func.func @kernel(%arg0: memref<8x128xbf16, #tpu.memory_space<vmem>>, %arg1: memref<128x128xbf16, #tpu.memory_space<vmem>>, %arg2: memref<1x128xf32, #tpu.memory_space<vmem>>, %arg3: memref<128x128xbf16, #tpu.memory_space<vmem>>, %arg4: memref<1x128xf32, #tpu.memory_space<vmem>>, %arg5: memref<128x128xbf16, #tpu.memory_space<vmem>>, %arg6: memref<1x128xf32, #tpu.memory_space<vmem>>, %arg7: memref<8x128xf32, #tpu.memory_space<vmem>>) attributes {dimension_semantics = [], scalar_prefetch = 0 : i64, scratch_operands = 0 : i64, tpu.core_type = #tpu.core_type<tc>} {
    %c0 = arith.constant 0 : index
    %c0_0 = arith.constant 0 : index
    %0 = vector.load %arg0[%c0, %c0_0] : memref<8x128xbf16, #tpu.memory_space<vmem>>, vector<8x128xbf16>
    %c0_1 = arith.constant 0 : index
    %c0_2 = arith.constant 0 : index
    %1 = vector.load %arg1[%c0_1, %c0_2] : memref<128x128xbf16, #tpu.memory_space<vmem>>, vector<128x128xbf16>
    %c0_3 = arith.constant 0 : index
    %c0_4 = arith.constant 0 : index
    %2 = vector.load %arg2[%c0_3, %c0_4] : memref<1x128xf32, #tpu.memory_space<vmem>>, vector<1x128xf32>
    %cst = arith.constant dense<0.000000e+00> : vector<8x128xf32>
    %3 = tpu.matmul %0, %1, %cst {dimension_numbers = #tpu.dot_dimension_numbers<[1], [0], [0], [1], [0, 0, 1, 1], [], []>} : vector<8x128xbf16>, vector<128x128xbf16>, vector<8x128xf32> -> vector<8x128xf32>
    %4 = vector.broadcast %2 : vector<1x128xf32> to vector<8x128xf32>
    %5 = arith.addf %3, %4 : vector<8x128xf32>
    %cst_5 = arith.constant 0.000000e+00 : f32
    %6 = vector.broadcast %cst_5 : f32 to vector<8x128xf32>
    %7 = arith.maximumf %5, %6 : vector<8x128xf32>
    %8 = arith.truncf %7 : vector<8x128xf32> to vector<8x128xbf16>
    %c0_6 = arith.constant 0 : index
    %c0_7 = arith.constant 0 : index
    %9 = vector.load %arg3[%c0_6, %c0_7] : memref<128x128xbf16, #tpu.memory_space<vmem>>, vector<128x128xbf16>
    %c0_8 = arith.constant 0 : index
    %c0_9 = arith.constant 0 : index
    %10 = vector.load %arg4[%c0_8, %c0_9] : memref<1x128xf32, #tpu.memory_space<vmem>>, vector<1x128xf32>
    %cst_10 = arith.constant dense<0.000000e+00> : vector<8x128xf32>
    %11 = tpu.matmul %8, %9, %cst_10 {dimension_numbers = #tpu.dot_dimension_numbers<[1], [0], [0], [1], [0, 0, 1, 1], [], []>} : vector<8x128xbf16>, vector<128x128xbf16>, vector<8x128xf32> -> vector<8x128xf32>
    %12 = vector.broadcast %10 : vector<1x128xf32> to vector<8x128xf32>
    %13 = arith.addf %11, %12 : vector<8x128xf32>
    %cst_11 = arith.constant 0.000000e+00 : f32
    %14 = vector.broadcast %cst_11 : f32 to vector<8x128xf32>
    %15 = arith.maximumf %13, %14 : vector<8x128xf32>
    %16 = arith.truncf %15 : vector<8x128xf32> to vector<8x128xbf16>
    %c0_12 = arith.constant 0 : index
    %c0_13 = arith.constant 0 : index
    %17 = vector.load %arg5[%c0_12, %c0_13] : memref<128x128xbf16, #tpu.memory_space<vmem>>, vector<128x128xbf16>
    %c0_14 = arith.constant 0 : index
    %c0_15 = arith.constant 0 : index
    %18 = vector.load %arg6[%c0_14, %c0_15] : memref<1x128xf32, #tpu.memory_space<vmem>>, vector<1x128xf32>
    %cst_16 = arith.constant dense<0.000000e+00> : vector<8x128xf32>
    %19 = tpu.matmul %16, %17, %cst_16 {dimension_numbers = #tpu.dot_dimension_numbers<[1], [0], [0], [1], [0, 0, 1, 1], [], []>} : vector<8x128xbf16>, vector<128x128xbf16>, vector<8x128xf32> -> vector<8x128xf32>
    %20 = vector.broadcast %18 : vector<1x128xf32> to vector<8x128xf32>
    %21 = arith.addf %19, %20 : vector<8x128xf32>
    %22 = tpu.iota {dimensions = array<i32: 1>} : vector<8x128xi32>
    %c10_i32 = arith.constant 10 : i32
    %23 = vector.broadcast %c10_i32 : i32 to vector<8x128xi32>
    %24 = arith.cmpi slt, %22, %23 : vector<8x128xi32>
    %cst_17 = arith.constant 0xFF800000 : f32
    %25 = vector.broadcast %cst_17 : f32 to vector<8x128xf32>
    %26 = arith.select %24, %21, %25 : vector<8x128xi1>, vector<8x128xf32>
    %cst_18 = arith.constant dense<0xFF800000> : vector<8xf32>
    %27 = vector.multi_reduction <maximumf>, %26, %cst_18 [1] : vector<8x128xf32> to vector<8xf32>
    %28 = vector.shape_cast %27 : vector<8xf32> to vector<8x1xf32>
    %29 = vector.broadcast %28 : vector<8x1xf32> to vector<8x128xf32>
    %30 = arith.subf %26, %29 : vector<8x128xf32>
    %31 = math.exp %30 : vector<8x128xf32>
    %cst_19 = arith.constant dense<0.000000e+00> : vector<8xf32>
    %32 = vector.multi_reduction <add>, %31, %cst_19 [1] : vector<8x128xf32> to vector<8xf32>
    %33 = vector.shape_cast %32 : vector<8xf32> to vector<8x1xf32>
    %34 = math.log %33 : vector<8x1xf32>
    %35 = vector.broadcast %34 : vector<8x1xf32> to vector<8x128xf32>
    %36 = arith.subf %30, %35 : vector<8x128xf32>
    %c0_20 = arith.constant 0 : index
    %c0_21 = arith.constant 0 : index
    %37 = vector.load %arg7[%c0_20, %c0_21] : memref<8x128xf32, #tpu.memory_space<vmem>>, vector<8x128xf32>
    tpu.vector_store %arg7[%c0_20, %c0_21], %36 {strides = array<i32>} : memref<8x128xf32, #tpu.memory_space<vmem>>, vector<8x128xf32>,
    return
  }
}

</mosaic_0001>

<bundles_post_ra>
// kernel: _lambda_.1
= control target key start
LH: loop header
LB: loop body
LE: loop exit
PB: predicated region body
PF: predicated region fallthrough
CT: control target
= control target key end

     0   :  { %12 = vsyncpa [#allocation3], 0  ;;  %s790_s0 = inlined_call_operand.vmem [shape: bf16[8,128], index: 0, kind: input, shape index: {}]   ;;  %s791_s1 = inlined_call_operand.hbm [shape: bf16[128,128], index: 1, kind: input, shape index: {}]   ;;  %s792_s2 = inlined_call_operand.vmem [shape: f32[1,128], index: 2, kind: input, shape index: {}]   ;;  %s793_s3 = inlined_call_operand.hbm [shape: bf16[128,128], index: 3, kind: input, shape index: {}]   ;;  %s794_s4 = inlined_call_operand.vmem [shape: f32[1,128], index: 4, kind: input, shape index: {}]   ;;  %s795_s5 = inlined_call_operand.hbm [shape: bf16[128,128], index: 5, kind: input, shape index: {}]   ;;  %s796_s6 = inlined_call_operand.vmem [shape: f32[1,128], index: 6, kind: input, shape index: {}]   ;;  %s797_s7 = inlined_call_operand.vmem [shape: f32[8,128], index: 7, kind: output, shape index: {}]  }
   0x1   :  { %13 = vsyncpa [#allocation5], 0  ;;  %s646_s24 = smov [#allocation4]   ;;  %s647_s26 = smov [#allocation2]  }
   0x2   :  { %s35_s25 = sshll.u32 %s646_s24, 4  ;;  %s21_s27 = sshll.u32 %s647_s26, 4  ;;  %s36_s25 = int_to_ptr.vmem [resolvable:$true] %s35_s25  ;;  %s693_s27 = int_to_ptr.vmem [resolvable:$true] %s21_s27 }
   0x3   :  { %s576_s30 = scalar_lea.hbm %s793_s3, 1024 }
   0x4   :  { %p577_p0 = scmp.ne.s32.totalorder %s793_s3, %s576_s30  ;;  %p580_p1 = scmp.lt.u32.totalorder %s576_s30, %s793_s3 }
   0x6   :  { %p582_p2 = pnand %p580_p1, %p577_p0 }
   0x8   :  { %585 = shalt.err (!%p582_p2)
}
   0x9   :  { %s586_s12 = scalar_lea.vmem %s36_s25, 1024  ;;  %p591_p4 = scmp.lt.s32.totalorder %s36_s25, %s36_s25 }
   0xa   :  { %p587_p3 = scmp.ne.s32.totalorder %s36_s25, %s586_s12  ;;  %p592_p5 = scmp.lt.s32.totalorder %s586_s12, %s586_s12 }
   0xc   :  { %p593_p6 = por %p592_p5, %p591_p4 }
   0xe   :  { %p594_p7 = pnand %p593_p6, %p587_p3 }
  0x10   :  { %597 = shalt.err (!%p594_p7)
}
  0x11   :  { %s648_s13 = smov 64   ;;  %s649_s14 = smov 4  }
  0x12   :  { %41 = dma.hbm_to_vmem [thread:$0]  %s793_s3, 1024, %s36_s25, [#allocation5], %s648_s13, %s648_s13, %s649_s14  }
  0x13   :  { %s598_s19 = scalar_lea.hbm %s791_s1, 1024 }
  0x14   :  { %p599_p8 = scmp.ne.s32.totalorder %s791_s1, %s598_s19  ;;  %p602_p9 = scmp.lt.u32.totalorder %s598_s19, %s791_s1 }
  0x16   :  { %p604_p10 = pnand %p602_p9, %p599_p8 }
  0x18   :  { %607 = shalt.err (!%p604_p10)
}
  0x19   :  { %s608_s24 = scalar_lea.vmem %s693_s27, 1024  ;;  %p613_p12 = scmp.lt.s32.totalorder %s693_s27, %s693_s27 }
  0x1a   :  { %p609_p11 = scmp.ne.s32.totalorder %s693_s27, %s608_s24  ;;  %p614_p13 = scmp.lt.s32.totalorder %s608_s24, %s608_s24 }
  0x1c   :  { %p615_p0 = por %p614_p13, %p613_p12 }
  0x1e   :  { %p616_p1 = pnand %p615_p0, %p609_p11 }
  0x20   :  { %619 = shalt.err (!%p616_p1)
}
  0x21   :  { %27 = dma.hbm_to_vmem [thread:$0]  %s791_s1, 1024, %s693_s27, [#allocation3], %s648_s13, %s648_s13, %s649_s14  }
  0x22   :  { %s650_s26 = smov [#allocation6]   ;;  %s620_s8 = scalar_lea.hbm %s795_s5, 1024 }
  0x23   :  { %s49_s28 = sshll.u32 %s650_s26, 4  ;;  %p621_p2 = scmp.ne.s32.totalorder %s795_s5, %s620_s8  ;;  %s50_s28 = int_to_ptr.vmem [resolvable:$true] %s49_s28 }
  0x24   :  { %p624_p3 = scmp.lt.u32.totalorder %s620_s8, %s795_s5 }
  0x26   :  { %p626_p4 = pnand %p624_p3, %p621_p2 }
  0x28   :  { %629 = shalt.err (!%p626_p4)
}
  0x29   :  { %s630_s15 = scalar_lea.vmem %s50_s28, 1024  ;;  %p635_p6 = scmp.lt.s32.totalorder %s50_s28, %s50_s28 }
  0x2a   :  { %p631_p5 = scmp.ne.s32.totalorder %s50_s28, %s630_s15  ;;  %p636_p7 = scmp.lt.s32.totalorder %s630_s15, %s630_s15 }
  0x2c   :  { %p637_p8 = por %p636_p7, %p635_p6 }
  0x2e   :  { %p638_p9 = pnand %p637_p8, %p631_p5 }
  0x30   :  { %641 = shalt.err (!%p638_p9)
}
  0x31   :  { %55 = dma.hbm_to_vmem [thread:$0]  %s795_s5, 1024, %s50_s28, [#allocation5], %s648_s13, %s648_s13, %s649_s14  }
  0x32   :  { %642 = dma.done.wait [#allocation3], 1024  }
  0x33   :  { %643 = vsyncadd [#allocation3], 4294966272 }
  0x34   :  { %644 = dma.done.wait [#allocation5], 2048  }
  0x35   :  { %645 = vsyncadd [#allocation5], 4294965248  ;;  %v651_v0 = vmov 0.0   ;;  %vm652_vm0 = vmmov 0   ;;  %v548_v1 = vld [vmem:[#allocation2] sm:$0xff]   ;;  %v549_v2 = vld [vmem:[#allocation2 + $0x8] sm:$0xff]   ;;  %v406_v42 = vlaneseq }
  0x36   :  { %481 = vmatprep.subr.bf16.mxu0 %v651_v0  ;;  %497 = vmatprep.mubr.msk.bf16.mxu0 %vm652_vm0, %v651_v0  ;;  %v550_v3 = vld [vmem:[#allocation2 + $0x10] sm:$0xff]   ;;  %v556_v4 = vld [vmem:[#allocation4] sm:$0xff]   ;;  %v551_v5 = vld [vmem:[#allocation2 + $0x18] sm:$0xff]  }
  0x37   :  { %501 = vmatprep.subr.bf16.mxu1 %v651_v0  ;;  %517 = vmatprep.mubr.msk.bf16.mxu1 %vm652_vm0, %v651_v0  ;;  %v557_v6 = vld [vmem:[#allocation4 + $0x8] sm:$0xff]   ;;  %v552_v7 = vld [vmem:[#allocation2 + $0x20] sm:$0xff]   ;;  %v558_v8 = vld [vmem:[#allocation4 + $0x10] sm:$0xff]   ;;  %v407_v43 = vand.u32 127, %v406_v42 }
  0x38   :  { %482 = vmatpush3.bf16.msra.mxu0 %v548_v1  ;;  %502 = vmatpush3.bf16.msra.mxu1 %v556_v4  ;;  %v553_v9 = vld [vmem:[#allocation2 + $0x28] sm:$0xff]   ;;  %v559_v10 = vld [vmem:[#allocation4 + $0x18] sm:$0xff]   ;;  %v554_v11 = vld [vmem:[#allocation2 + $0x30] sm:$0xff]  }
  0x39   :  { %483 = vmatprep.subr.bf16.mxu0 %v651_v0  ;;  %503 = vmatprep.subr.bf16.mxu1 %v651_v0  ;;  %v560_v12 = vld [vmem:[#allocation4 + $0x20] sm:$0xff]   ;;  %v555_v13 = vld [vmem:[#allocation2 + $0x38] sm:$0xff]   ;;  %v561_v14 = vld [vmem:[#allocation4 + $0x28] sm:$0xff]   ;;  %vm408_vm1 = vcmp.lt.s32.totalorder %v407_v43, 10 }
  0x3a   :  { %v68_v15 = vld [vmem:[%s790_s0] sm:$0xf]  ;;  %v562_v16 = vld [vmem:[#allocation4 + $0x30] sm:$0xff]   ;;  %v563_v17 = vld [vmem:[#allocation4 + $0x38] sm:$0xff]  }
  0x3b   :  { %v564_v18 = vld [vmem:[#allocation6] sm:$0xff]   ;;  %v565_v19 = vld [vmem:[#allocation6 + $0x8] sm:$0xff]   ;;  %v566_v20 = vld [vmem:[#allocation6 + $0x10] sm:$0xff]  }
  0x3c   :  { %484 = vmatpush3.bf16.msra.mxu0 %v549_v2  ;;  %504 = vmatpush3.bf16.msra.mxu1 %v557_v6  ;;  %v567_v21 = vld [vmem:[#allocation6 + $0x18] sm:$0xff]   ;;  %v568_v22 = vld [vmem:[#allocation6 + $0x20] sm:$0xff]   ;;  %v569_v23 = vld [vmem:[#allocation6 + $0x28] sm:$0xff]  }
  0x3d   :  { %485 = vmatprep.subr.bf16.mxu0 %v651_v0  ;;  %505 = vmatprep.subr.bf16.mxu1 %v651_v0  ;;  %v427_v24 = vld [vmem:[%s792_s2] ss:$0 sm:$0xff]  ;;  %v570_v32 = vld [vmem:[#allocation6 + $0x30] sm:$0xff]   ;;  %v571_v33 = vld [vmem:[#allocation6 + $0x38] sm:$0xff]  }
  0x3e   :  { %v436_v34 = vld [vmem:[%s794_s4] ss:$0 sm:$0xff] }
  0x3f   :  { %v445_v44 = vld [vmem:[%s796_s6] ss:$0 sm:$0xff] }
  0x40   :  { %486 = vmatpush3.bf16.msra.mxu0 %v550_v3  ;;  %506 = vmatpush3.bf16.msra.mxu1 %v558_v8 }
  0x41   :  { %487 = vmatprep.subr.bf16.mxu0 %v651_v0  ;;  %507 = vmatprep.subr.bf16.mxu1 %v651_v0 }
  0x44   :  { %488 = vmatpush3.bf16.msra.mxu0 %v551_v5  ;;  %508 = vmatpush3.bf16.msra.mxu1 %v559_v10 }
  0x45   :  { %489 = vmatprep.subr.bf16.mxu0 %v651_v0  ;;  %509 = vmatprep.subr.bf16.mxu1 %v651_v0 }
  0x48   :  { %490 = vmatpush3.bf16.msra.mxu0 %v552_v7  ;;  %510 = vmatpush3.bf16.msra.mxu1 %v560_v12 }
  0x49   :  { %491 = vmatprep.subr.bf16.mxu0 %v651_v0  ;;  %511 = vmatprep.subr.bf16.mxu1 %v651_v0 }
  0x4c   :  { %492 = vmatpush3.bf16.msra.mxu0 %v553_v9  ;;  %512 = vmatpush3.bf16.msra.mxu1 %v561_v14 }
  0x4d   :  { %493 = vmatprep.subr.bf16.mxu0 %v651_v0  ;;  %513 = vmatprep.subr.bf16.mxu1 %v651_v0 }
  0x50   :  { %494 = vmatpush3.bf16.msra.mxu0 %v554_v11  ;;  %514 = vmatpush3.bf16.msra.mxu1 %v562_v16 }
  0x51   :  { %495 = vmatprep.subr.bf16.mxu0 %v651_v0  ;;  %515 = vmatprep.subr.bf16.mxu1 %v651_v0 }
  0x54   :  { %496 = vmatpush3.bf16.msra.mxu0 %v555_v13  ;;  %516 = vmatpush3.bf16.msra.mxu1 %v563_v17 }
  0x55   :  { %521 = vmatprep.subr.bf16.mxu0 %v651_v0 }
  0x57   :  { %498 = vmatmul.mubr.bf16.vlgmr.msra.gmra.mrb[0].mxu0 %v68_v15 }
  0x58   :  { %537 = vmatprep.mubr.msk.bf16.mxu0 %vm652_vm0, %v651_v0  ;;  %522 = vmatpush3.bf16.msra.mxu0 %v564_v18 }
  0x59   :  { %523 = vmatprep.subr.bf16.mxu0 %v651_v0 }
  0x5c   :  { %524 = vmatpush3.bf16.msra.mxu0 %v565_v19 }
  0x5d   :  { %525 = vmatprep.subr.bf16.mxu0 %v651_v0 }
  0x60   :  { %526 = vmatpush3.bf16.msra.mxu0 %v566_v20 }
  0x61   :  { %527 = vmatprep.subr.bf16.mxu0 %v651_v0 }
  0x64   :  { %528 = vmatpush3.bf16.msra.mxu0 %v567_v21 }
  0x65   :  { %529 = vmatprep.subr.bf16.mxu0 %v651_v0 }
  0x68   :  { %530 = vmatpush3.bf16.msra.mxu0 %v568_v22 }
  0x69   :  { %531 = vmatprep.subr.bf16.mxu0 %v651_v0 }
  0x6c   :  { %532 = vmatpush3.bf16.msra.mxu0 %v569_v23 }
  0x6d   :  { %533 = vmatprep.subr.bf16.mxu0 %v651_v0 }
  0x70   :  { %534 = vmatpush3.bf16.msra.mxu0 %v570_v32 }
  0x71   :  { %535 = vmatprep.subr.bf16.mxu0 %v651_v0 }
  0x74   :  { %536 = vmatpush3.bf16.msra.mxu0 %v571_v33 }
 0x12a   :  { %v174_v25 = vpop.f32.mrb[0].mxu0 }
 0x12b   :  { %v175_v26 = vadd.f32 %v427_v24, %v174_v25  ;;  %v499_v27 = vpop.f32.mrb[1].mxu0 }
 0x12c   :  { %v177_v28 = vpop.f32.mrb[2].mxu0 }
 0x12d   :  { %v180_v29 = vmax.f32 %v175_v26, 0.0  ;;  %v500_v30 = vpop.f32.mrb[3].mxu0 }
 0x12f   :  { %v181_v31 = vpack.c.bf16 %v180_v29, %v180_v29 }
 0x131   :  { %518 = vmatmul.mubr.bf16.vlgmr.msra.gmra.mrb[0].mxu1 %v181_v31 }
 0x204   :  { %v287_v35 = vpop.f32.mrb[0].mxu1 }
 0x205   :  { %v288_v36 = vadd.f32 %v436_v34, %v287_v35  ;;  %v519_v37 = vpop.f32.mrb[1].mxu1 }
 0x206   :  { %v290_v38 = vpop.f32.mrb[2].mxu1 }
 0x207   :  { %v293_v39 = vmax.f32 %v288_v36, 0.0  ;;  %v520_v40 = vpop.f32.mrb[3].mxu1 }
 0x209   :  { %v294_v41 = vpack.c.bf16 %v293_v39, %v293_v39 }
 0x20b   :  { %538 = vmatmul.mubr.bf16.vlgmr.msra.gmra.mrb[4].mxu0 %v294_v41 }
 0x2de   :  { %v400_v45 = vpop.f32.mrb[4].mxu0 }
 0x2df   :  { %v401_v46 = vadd.f32 %v445_v44, %v400_v45  ;;  %v539_v47 = vpop.f32.mrb[5].mxu0 }
 0x2e0   :  { %v403_v48 = vpop.f32.mrb[6].mxu0 }
 0x2e1   :  { %v540_v49 = vpop.f32.mrb[7].mxu0  ;;  %v409_v50 = vsel %vm408_vm1, %v401_v46, -inf }
 0x2e2   :  { %410 = vmax.xlane.f32.xlu0 %v409_v50 }
 0x36f   :  { %v411_v51 = vpop.xlane.xlu0 %410 }
 0x370   :  { %v412_v52 = vsub.f32 %v409_v50, %v411_v51 }
 0x372   :  { %v413_v53 = vmul.f32 1.442695, %v412_v52 }
 0x374   :  { %572 = vpow2.f32 %v413_v53 }
 0x37e   :  { %v573_v54 = vpop.eup %572 }
 0x37f   :  { %415 = vadd.xlane.f32.xlu0 %v573_v54 }
 0x40c   :  { %v416_v55 = vpop.xlane.xlu0 %415 }
 0x40d   :  { %574 = vlog2.f32 %v416_v55 }
 0x417   :  { %v575_v56 = vpop.eup %574 }
 0x418   :  { %v418_v57 = vmul.f32 0.6931472, %v575_v56 }
 0x41a   :  { %v419_v58 = vsub.f32 %v412_v52, %v418_v57 }
 0x41c   :  { %420 = vst [vmem:[%s797_s7] sm:$0xff] %v419_v58 }
 0x41d   :  { %425 = vsyncpa [#allocation3], 1 }
 0x41e   :  { %426 = vsyncpa [#allocation5], 1 }

</bundles_post_ra>
